<compile_context>
chip_gen: v6e
topology: v6e:2x2x1
jax: 0.10.0
libtpu: 0.0.40
codegen_flags: <defaults>
</compile_context>

<pallas_src>
import math
from functools import partial

import jax
import jax.numpy as jnp
from jax import lax
from jax.experimental import pallas as pl
from jax.experimental.pallas import tpu as pltpu

# ---------------- config (small, consistent with the module) ----------------
BATCH = 2
SEQ = 8
HIDDEN = 32
NUM_HEADS = 4
HEAD_DIM = HIDDEN // NUM_HEADS            # 8
HALF = HEAD_DIM // 2                      # 4
NUM_KV_HEADS = 2
N_REP = NUM_HEADS // NUM_KV_HEADS         # num_key_value_groups = 2
ROPE_BASE = 10000.0
Q_POS = NUM_HEADS * HEAD_DIM              # 32
KV_DIM = NUM_KV_HEADS * HEAD_DIM          # 16
QK_DIM = Q_POS + KV_DIM                   # 48   (Q + K slab, both get RoPE)
OP_SIZE = Q_POS + 2 * KV_DIM              # 64
PACKED_OUT = HIDDEN + 2 * KV_DIM          # 64   [o_proj | key_cache | value_cache]
ROWS = BATCH * SEQ                        # 16
DTYPE = jnp.float32


# ----------------------------- fused Pallas kernel ----------------------------
def _fused_attn_kernel(x_ref, wqkv_ref, wo_ref, rope_ref, bias_ref,
                       out_ref, attn_ref, *, scale):
    """Entire Phi-3 attention forward for all batches/heads in one block.

    x_ref:    (B*S, HIDDEN)                 batch-flattened activations
    wqkv_ref: (OP_SIZE, HIDDEN)             nn.Linear (out, in) layout
    wo_ref:   (HIDDEN, NUM_HEADS*HEAD_DIM)  nn.Linear (out, in) layout
    rope_ref: (B*S, 2*QK_DIM)               [cos tiled over q+k heads | sin tiled]
    bias_ref: (B, S, S)                     additive mask bias (0 attend / -1e30 masked)
    out_ref:  (B*S, PACKED_OUT)             packed [o_proj | key_cache | value_cache]
    attn_ref: (B*S, Q_POS) f32 VMEM scratch for the pre-o_proj attention slab
    """
    x = x_ref[...]                                               # (ROWS, HIDDEN) f32

    # ---- single batch-flattened QKV projection: x @ w_qkv.T ----
    qkv = lax.dot_general(x, wqkv_ref[...], (((1,), (1,)), ((), ())),
                          preferred_element_type=jnp.float32)    # (ROWS, OP_SIZE)

    # ---- RoPE on the whole [Q | K] slab at once (cos/sin pre-tiled per head) ----
    qk_lin = qkv[:, :QK_DIM]                                     # (ROWS, 48)
    cos_all = rope_ref[:, :QK_DIM]                               # (ROWS, 48)
    sin_all = rope_ref[:, QK_DIM:]                               # (ROWS, 48)
    parts = []
    for hh in range(NUM_HEADS + NUM_KV_HEADS):                   # rotate_half per head
        base = hh * HEAD_DIM
        parts.append(-qk_lin[:, base + HALF:base + HEAD_DIM])
        parts.append(qk_lin[:, base:base + HALF])
    qk_rot = jnp.concatenate(parts, axis=-1)                     # (ROWS, 48)
    qk = qk_lin * cos_all + qk_rot * sin_all                     # roped Q|K slab

    q = qk[:, :Q_POS]                                            # (ROWS, 32)
    k = qk[:, Q_POS:]                                            # (ROWS, 16) == key_cache
    v = qkv[:, QK_DIM:]                                          # (ROWS, 16) == value_cache

    # ---- attention: one QK^T dot and one PV dot per (batch, kv-group) ----
    for b in range(BATCH):                                       # tiny, fully unrolled
        r0 = b * SEQ
        bias_b = bias_ref[b]                                     # (S, S), same for all heads
        bias_rep = jnp.concatenate([bias_b] * N_REP, axis=0)     # (N_REP*S, S)
        for g in range(NUM_KV_HEADS):
            # stack the N_REP query heads of this group along sublanes
            q_g = jnp.concatenate(
                [q[r0:r0 + SEQ,
                   (g * N_REP + r) * HEAD_DIM:(g * N_REP + r + 1) * HEAD_DIM]
                 for r in range(N_REP)], axis=0)                 # (N_REP*S, D)
            k_g = k[r0:r0 + SEQ, g * HEAD_DIM:(g + 1) * HEAD_DIM]   # (S, D)
            v_g = v[r0:r0 + SEQ, g * HEAD_DIM:(g + 1) * HEAD_DIM]   # (S, D)

            # q . k over D without materializing k.T
            scores = lax.dot_general(q_g, k_g, (((1,), (1,)), ((), ())),
                                     preferred_element_type=jnp.float32)
            scores = scores * scale + bias_rep                   # (N_REP*S, S)
            scores = scores - jnp.max(scores, axis=-1, keepdims=True)
            p = jnp.exp(scores)
            p = p * pl.reciprocal(jnp.sum(p, axis=-1, keepdims=True), approx=False)
            pv = jnp.dot(p, v_g, preferred_element_type=jnp.float32)  # (N_REP*S, D)

            # write each head's result directly into its lane offset (no concat)
            for r in range(N_REP):
                h = g * N_REP + r
                attn_ref[r0:r0 + SEQ, h * HEAD_DIM:(h + 1) * HEAD_DIM] = \
                    pv[r * SEQ:(r + 1) * SEQ, :]

    # ---- single batch-flattened output projection + packed lane-dense store ----
    out = lax.dot_general(attn_ref[...], wo_ref[...], (((1,), (1,)), ((), ())),
                          preferred_element_type=jnp.float32)    # (ROWS, HIDDEN)
    packed = jnp.concatenate([out, k, v], axis=-1)               # (ROWS, PACKED_OUT)
    out_ref[...] = packed.astype(out_ref.dtype)                  # one full-row store


# ------------------------------ glue (plain JAX) ------------------------------
def rope_cos_sin(position_ids, dim, base, dtype):
    """_Phi3RotaryEmbedding (rope_scaling=None)."""
    inv_freq = 1.0 / (base ** (jnp.arange(0, dim, 2, dtype=jnp.float32) / dim))
    freqs = position_ids[:, :, None].astype(jnp.float32) * inv_freq[None, None, :]
    emb = jnp.concatenate([freqs, freqs], axis=-1)               # (B, S, D)
    return jnp.cos(emb).astype(dtype), jnp.sin(emb).astype(dtype)


def phi3_attention(hidden_states, attention_mask, position_ids, w_qkv, w_o):
    """Mirrors _Phi3Attention.forward (past_key_value=None, dropout=0, eval mode).

    attention_mask is multiplicative-style (>=0.1 attend, <0.1 masked), matching
    the module's `masked_fill(attention_mask < 0.1, -inf)`.
    """
    B, S, H = hidden_states.shape
    # kernel body is specialized to the compile-time constants
    assert (B, S, H) == (BATCH, SEQ, HIDDEN), "kernel compiled for fixed shapes"
    assert w_qkv.shape == (OP_SIZE, HIDDEN)
    assert w_o.shape == (HIDDEN, Q_POS)
    assert attention_mask.shape == (B, 1, S, S)

    cos, sin = rope_cos_sin(position_ids, HEAD_DIM, ROPE_BASE, hidden_states.dtype)
    cos_f = cos.reshape(B * S, HEAD_DIM)
    sin_f = sin.reshape(B * S, HEAD_DIM)
    n_rope_heads = NUM_HEADS + NUM_KV_HEADS
    # one packed rope table: [cos tiled over q+k heads | sin tiled over q+k heads]
    rope_tab = jnp.concatenate(
        [jnp.tile(cos_f, (1, n_rope_heads)), jnp.tile(sin_f, (1, n_rope_heads))],
        axis=-1).astype(hidden_states.dtype)                     # (B*S, 2*QK_DIM)

    # additive mask bias, identical across heads (robust finite -1e30, never NaNs)
    bias = jnp.where(attention_mask[:, 0] < 0.1, -1e30, 0.0).astype(jnp.float32)  # (B,S,S)

    x_flat = hidden_states.reshape(B * S, H)

    packed = pl.pallas_call(
        partial(_fused_attn_kernel, scale=1.0 / math.sqrt(HEAD_DIM)),
        out_shape=jax.ShapeDtypeStruct((B * S, PACKED_OUT), hidden_states.dtype),
        grid=(1,),
        in_specs=[
            pl.BlockSpec((B * S, HIDDEN), lambda i: (0, 0)),
            pl.BlockSpec((OP_SIZE, HIDDEN), lambda i: (0, 0)),
            pl.BlockSpec((HIDDEN, Q_POS), lambda i: (0, 0)),
            pl.BlockSpec((B * S, 2 * QK_DIM), lambda i: (0, 0)),
            pl.BlockSpec((B, S, S), lambda i: (0, 0, 0)),
        ],
        out_specs=pl.BlockSpec((B * S, PACKED_OUT), lambda i: (0, 0)),
        scratch_shapes=[pltpu.VMEM((B * S, Q_POS), jnp.float32)],
        compiler_params=pltpu.CompilerParams(
            dimension_semantics=("arbitrary",)),
    )(x_flat, w_qkv, w_o, rope_tab, bias)

    out = packed[:, :HIDDEN].reshape(B, S, HIDDEN)
    key_cache = packed[:, HIDDEN:HIDDEN + KV_DIM].reshape(
        B, S, NUM_KV_HEADS, HEAD_DIM).transpose(0, 2, 1, 3)
    value_cache = packed[:, HIDDEN + KV_DIM:].reshape(
        B, S, NUM_KV_HEADS, HEAD_DIM).transpose(0, 2, 1, 3)
    return out, key_cache, value_cache


# ------------------------------ pure-JAX reference ----------------------------
def _rotate_half(x):
    half = x.shape[-1] // 2
    return jnp.concatenate([-x[..., half:], x[..., :half]], axis=-1)


def reference(hidden_states, attention_mask, position_ids, w_qkv, w_o):
    B, S, H = hidden_states.shape
    qkv = hidden_states @ w_qkv.T
    q = qkv[..., :Q_POS].reshape(B, S, NUM_HEADS, HEAD_DIM).transpose(0, 2, 1, 3)
    k = qkv[..., Q_POS:Q_POS + KV_DIM].reshape(B, S, NUM_KV_HEADS, HEAD_DIM).transpose(0, 2, 1, 3)
    v = qkv[..., Q_POS + KV_DIM:].reshape(B, S, NUM_KV_HEADS, HEAD_DIM).transpose(0, 2, 1, 3)
    cos, sin = rope_cos_sin(position_ids, HEAD_DIM, ROPE_BASE, hidden_states.dtype)
    cosb, sinb = cos[:, None], sin[:, None]
    q = q * cosb + _rotate_half(q) * sinb
    k = k * cosb + _rotate_half(k) * sinb
    kr = jnp.repeat(k, N_REP, axis=1)
    vr = jnp.repeat(v, N_REP, axis=1)
    w = jnp.einsum("bhqd,bhkd->bhqk", q, kr) / math.sqrt(HEAD_DIM)
    w = jnp.where(attention_mask < 0.1, -jnp.inf, w)
    w = jax.nn.softmax(w.astype(jnp.float32), axis=-1).astype(vr.dtype)
    o = jnp.einsum("bhqk,bhkd->bhqd", w, vr)
    o = o.transpose(0, 2, 1, 3).reshape(B, S, HIDDEN)
    return o @ w_o.T, k, v


# ----------------------------------- main -------------------------------------
if __name__ == "__main__":
    key = jax.random.PRNGKey(0)
    k_x, k_qkv, k_o = jax.random.split(key, 3)

    hidden_states = jax.random.normal(k_x, (BATCH, SEQ, HIDDEN), dtype=DTYPE)
    position_ids = jnp.broadcast_to(jnp.arange(SEQ, dtype=jnp.int32)[None, :], (BATCH, SEQ))
    # causal attention mask: 1.0 = attend, 0.0 = masked
    causal = jnp.tril(jnp.ones((SEQ, SEQ), dtype=DTYPE))
    attention_mask = jnp.broadcast_to(causal[None, None], (BATCH, 1, SEQ, SEQ))

    # deterministic synthetic weights (nn.Linear weight layout: (out_features, in_features))
    w_qkv = 0.02 * jax.random.normal(k_qkv, (OP_SIZE, HIDDEN), dtype=DTYPE)
    w_o = 0.02 * jax.random.normal(k_o, (HIDDEN, NUM_HEADS * HEAD_DIM), dtype=DTYPE)

    out, key_cache, value_cache = phi3_attention(
        hidden_states, attention_mask, position_ids, w_qkv, w_o
    )
    jax.block_until_ready(out)
    jax.block_until_ready(key_cache)
    jax.block_until_ready(value_cache)

    ref_out, ref_k, ref_v = reference(
        hidden_states, attention_mask, position_ids, w_qkv, w_o
    )
    assert out.shape == (BATCH, SEQ, HIDDEN)
    assert key_cache.shape == (BATCH, NUM_KV_HEADS, SEQ, HEAD_DIM)
    assert value_cache.shape == (BATCH, NUM_KV_HEADS, SEQ, HEAD_DIM)
    assert jnp.allclose(out, ref_out, rtol=1e-5, atol=1e-5)
    assert jnp.allclose(key_cache, ref_k, rtol=1e-5, atol=1e-5)
    assert jnp.allclose(value_cache, ref_v, rtol=1e-5, atol=1e-5)

    print("KERNEL_OK")
</pallas_src>

<mosaic_0001>
module attributes {stable_mosaic.version = 11 : i64} {
  func.func @_fused_attn_kernel(%arg0: i32, %arg1: memref<16x32xf32, #tpu.memory_space<vmem>>, %arg2: memref<64x32xf32, #tpu.memory_space<vmem>>, %arg3: memref<32x32xf32, #tpu.memory_space<vmem>>, %arg4: memref<16x96xf32, #tpu.memory_space<vmem>>, %arg5: memref<2x8x8xf32, #tpu.memory_space<vmem>>, %arg6: memref<16x64xf32, #tpu.memory_space<vmem>>, %arg7: memref<16x32xf32, #tpu.memory_space<vmem>>) attributes {dimension_semantics = [#tpu.dimension_semantics<arbitrary>], iteration_bounds = array<i64: 1>, scalar_prefetch = 0 : i64, scratch_operands = 1 : i64, tpu.core_type = #tpu.core_type<tc>, window_params = [{pipeline_mode = #tpu.pipeline_mode<synchronous>, transform_indices = @transform_0, window_bounds = array<i64: 16, 32>}, {pipeline_mode = #tpu.pipeline_mode<synchronous>, transform_indices = @transform_1, window_bounds = array<i64: 64, 32>}, {pipeline_mode = #tpu.pipeline_mode<synchronous>, transform_indices = @transform_2, window_bounds = array<i64: 32, 32>}, {pipeline_mode = #tpu.pipeline_mode<synchronous>, transform_indices = @transform_3, window_bounds = array<i64: 16, 96>}, {pipeline_mode = #tpu.pipeline_mode<synchronous>, transform_indices = @transform_4, window_bounds = array<i64: 2, 8, 8>}, {pipeline_mode = #tpu.pipeline_mode<synchronous>, transform_indices = @transform_5, window_bounds = array<i64: 16, 64>}]} {
    %c0 = arith.constant 0 : index
    %c0_0 = arith.constant 0 : index
    %0 = vector.load %arg1[%c0, %c0_0] : memref<16x32xf32, #tpu.memory_space<vmem>>, vector<16x32xf32>
    %c0_1 = arith.constant 0 : index
    %c0_2 = arith.constant 0 : index
    %1 = vector.load %arg2[%c0_1, %c0_2] : memref<64x32xf32, #tpu.memory_space<vmem>>, vector<64x32xf32>
    %cst = arith.constant dense<0.000000e+00> : vector<16x64xf32>
    %2 = tpu.matmul %0, %1, %cst {dimension_numbers = #tpu.dot_dimension_numbers<[1], [1], [0], [0], [0, 0, 1, 0], [], []>} : vector<16x32xf32>, vector<64x32xf32>, vector<16x64xf32> -> vector<16x64xf32>
    %3 = vector.extract_strided_slice %2 {offsets = [0, 0], sizes = [16, 48], strides = [1, 1]} : vector<16x64xf32> to vector<16x48xf32>
    %c0_3 = arith.constant 0 : index
    %c0_4 = arith.constant 0 : index
    %4 = vector.load %arg4[%c0_3, %c0_4] : memref<16x96xf32, #tpu.memory_space<vmem>>, vector<16x48xf32>
    %c0_5 = arith.constant 0 : index
    %c48 = arith.constant 48 : index
    %5 = vector.load %arg4[%c0_5, %c48] : memref<16x96xf32, #tpu.memory_space<vmem>>, vector<16x48xf32>
    %6 = vector.extract_strided_slice %3 {offsets = [0, 4], sizes = [16, 4], strides = [1, 1]} : vector<16x48xf32> to vector<16x4xf32>
    %cst_6 = arith.constant 0.000000e+00 : f32
    %7 = vector.broadcast %cst_6 : f32 to vector<16x4xf32>
    %8 = arith.subf %7, %6 : vector<16x4xf32>
    %9 = vector.extract_strided_slice %3 {offsets = [0, 0], sizes = [16, 4], strides = [1, 1]} : vector<16x48xf32> to vector<16x4xf32>
    %10 = vector.extract_strided_slice %3 {offsets = [0, 12], sizes = [16, 4], strides = [1, 1]} : vector<16x48xf32> to vector<16x4xf32>
    %cst_7 = arith.constant 0.000000e+00 : f32
    %11 = vector.broadcast %cst_7 : f32 to vector<16x4xf32>
    %12 = arith.subf %11, %10 : vector<16x4xf32>
    %13 = vector.extract_strided_slice %3 {offsets = [0, 8], sizes = [16, 4], strides = [1, 1]} : vector<16x48xf32> to vector<16x4xf32>
    %14 = vector.extract_strided_slice %3 {offsets = [0, 20], sizes = [16, 4], strides = [1, 1]} : vector<16x48xf32> to vector<16x4xf32>
    %cst_8 = arith.constant 0.000000e+00 : f32
    %15 = vector.broadcast %cst_8 : f32 to vector<16x4xf32>
    %16 = arith.subf %15, %14 : vector<16x4xf32>
    %17 = vector.extract_strided_slice %3 {offsets = [0, 16], sizes = [16, 4], strides = [1, 1]} : vector<16x48xf32> to vector<16x4xf32>
    %18 = vector.extract_strided_slice %3 {offsets = [0, 28], sizes = [16, 4], strides = [1, 1]} : vector<16x48xf32> to vector<16x4xf32>
    %cst_9 = arith.constant 0.000000e+00 : f32
    %19 = vector.broadcast %cst_9 : f32 to vector<16x4xf32>
    %20 = arith.subf %19, %18 : vector<16x4xf32>
    %21 = vector.extract_strided_slice %3 {offsets = [0, 24], sizes = [16, 4], strides = [1, 1]} : vector<16x48xf32> to vector<16x4xf32>
    %22 = vector.extract_strided_slice %3 {offsets = [0, 36], sizes = [16, 4], strides = [1, 1]} : vector<16x48xf32> to vector<16x4xf32>
    %cst_10 = arith.constant 0.000000e+00 : f32
    %23 = vector.broadcast %cst_10 : f32 to vector<16x4xf32>
    %24 = arith.subf %23, %22 : vector<16x4xf32>
    %25 = vector.extract_strided_slice %3 {offsets = [0, 32], sizes = [16, 4], strides = [1, 1]} : vector<16x48xf32> to vector<16x4xf32>
    %26 = vector.extract_strided_slice %3 {offsets = [0, 44], sizes = [16, 4], strides = [1, 1]} : vector<16x48xf32> to vector<16x4xf32>
    %cst_11 = arith.constant 0.000000e+00 : f32
    %27 = vector.broadcast %cst_11 : f32 to vector<16x4xf32>
    %28 = arith.subf %27, %26 : vector<16x4xf32>
    %29 = vector.extract_strided_slice %3 {offsets = [0, 40], sizes = [16, 4], strides = [1, 1]} : vector<16x48xf32> to vector<16x4xf32>
    %30 = tpu.concatenate %8, %9, %12, %13, %16, %17, %20, %21, %24, %25, %28, %29 in 1 : vector<16x4xf32>, vector<16x4xf32>, vector<16x4xf32>, vector<16x4xf32>, vector<16x4xf32>, vector<16x4xf32>, vector<16x4xf32>, vector<16x4xf32>, vector<16x4xf32>, vector<16x4xf32>, vector<16x4xf32>, vector<16x4xf32> -> vector<16x48xf32>
    %31 = arith.mulf %3, %4 : vector<16x48xf32>
    %32 = arith.mulf %30, %5 : vector<16x48xf32>
    %33 = arith.addf %31, %32 : vector<16x48xf32>
    %34 = vector.extract_strided_slice %33 {offsets = [0, 0], sizes = [16, 32], strides = [1, 1]} : vector<16x48xf32> to vector<16x32xf32>
    %35 = vector.extract_strided_slice %33 {offsets = [0, 32], sizes = [16, 16], strides = [1, 1]} : vector<16x48xf32> to vector<16x16xf32>
    %36 = vector.extract_strided_slice %2 {offsets = [0, 48], sizes = [16, 16], strides = [1, 1]} : vector<16x64xf32> to vector<16x16xf32>
    %c0_12 = arith.constant 0 : index
    %c0_13 = arith.constant 0 : index
    %c0_14 = arith.constant 0 : index
    %37 = vector.load %arg5[%c0_12, %c0_13, %c0_14] : memref<2x8x8xf32, #tpu.memory_space<vmem>>, vector<1x8x8xf32>
    %38 = vector.shape_cast %37 : vector<1x8x8xf32> to vector<8x8xf32>
    %39 = tpu.concatenate %38, %38 in 0 : vector<8x8xf32>, vector<8x8xf32> -> vector<16x8xf32>
    %40 = vector.extract_strided_slice %34 {offsets = [0, 0], sizes = [8, 8], strides = [1, 1]} : vector<16x32xf32> to vector<8x8xf32>
    %41 = vector.extract_strided_slice %34 {offsets = [0, 8], sizes = [8, 8], strides = [1, 1]} : vector<16x32xf32> to vector<8x8xf32>
    %42 = tpu.concatenate %40, %41 in 0 : vector<8x8xf32>, vector<8x8xf32> -> vector<16x8xf32>
    %43 = vector.extract_strided_slice %35 {offsets = [0, 0], sizes = [8, 8], strides = [1, 1]} : vector<16x16xf32> to vector<8x8xf32>
    %44 = vector.extract_strided_slice %36 {offsets = [0, 0], sizes = [8, 8], strides = [1, 1]} : vector<16x16xf32> to vector<8x8xf32>
    %cst_15 = arith.constant dense<0.000000e+00> : vector<16x8xf32>
    %45 = tpu.matmul %42, %43, %cst_15 {dimension_numbers = #tpu.dot_dimension_numbers<[1], [1], [0], [0], [0, 0, 1, 0], [], []>} : vector<16x8xf32>, vector<8x8xf32>, vector<16x8xf32> -> vector<16x8xf32>
    %cst_16 = arith.constant 0.353553385 : f32
    %46 = vector.broadcast %cst_16 : f32 to vector<16x8xf32>
    %47 = arith.mulf %45, %46 : vector<16x8xf32>
    %48 = arith.addf %47, %39 : vector<16x8xf32>
    %cst_17 = arith.constant dense<0xFF800000> : vector<16xf32>
    %49 = vector.multi_reduction <maximumf>, %48, %cst_17 [1] : vector<16x8xf32> to vector<16xf32>
    %50 = vector.shape_cast %49 : vector<16xf32> to vector<16x1xf32>
    %51 = vector.broadcast %50 : vector<16x1xf32> to vector<16x8xf32>
    %52 = arith.subf %48, %51 : vector<16x8xf32>
    %53 = math.exp %52 : vector<16x8xf32>
    %cst_18 = arith.constant dense<0.000000e+00> : vector<16xf32>
    %54 = vector.multi_reduction <add>, %53, %cst_18 [1] : vector<16x8xf32> to vector<16xf32>
    %55 = vector.shape_cast %54 : vector<16xf32> to vector<16x1xf32>
    %56 = tpu.reciprocal %55 : vector<16x1xf32> -> vector<16x1xf32>
    %57 = vector.broadcast %56 : vector<16x1xf32> to vector<16x8xf32>
    %58 = arith.mulf %53, %57 : vector<16x8xf32>
    %cst_19 = arith.constant dense<0.000000e+00> : vector<16x8xf32>
    %59 = tpu.matmul %58, %44, %cst_19 {dimension_numbers = #tpu.dot_dimension_numbers<[1], [0], [0], [1], [0, 0, 1, 1], [], []>} : vector<16x8xf32>, vector<8x8xf32>, vector<16x8xf32> -> vector<16x8xf32>
    %60 = vector.extract_strided_slice %59 {offsets = [0, 0], sizes = [8, 8], strides = [1, 1]} : vector<16x8xf32> to vector<8x8xf32>
    %c0_20 = arith.constant 0 : index
    %c0_21 = arith.constant 0 : index
    %61 = vector.load %arg7[%c0_20, %c0_21] : memref<16x32xf32, #tpu.memory_space<vmem>>, vector<8x8xf32>
    tpu.vector_store %arg7[%c0_20, %c0_21], %60 {strides = array<i32>} : memref<16x32xf32, #tpu.memory_space<vmem>>, vector<8x8xf32>,
    %62 = vector.extract_strided_slice %59 {offsets = [8, 0], sizes = [8, 8], strides = [1, 1]} : vector<16x8xf32> to vector<8x8xf32>
    %c0_22 = arith.constant 0 : index
    %c8 = arith.constant 8 : index
    %63 = vector.load %arg7[%c0_22, %c8] : memref<16x32xf32, #tpu.memory_space<vmem>>, vector<8x8xf32>
    tpu.vector_store %arg7[%c0_22, %c8], %62 {strides = array<i32>} : memref<16x32xf32, #tpu.memory_space<vmem>>, vector<8x8xf32>,
    %64 = vector.extract_strided_slice %34 {offsets = [0, 16], sizes = [8, 8], strides = [1, 1]} : vector<16x32xf32> to vector<8x8xf32>
    %65 = vector.extract_strided_slice %34 {offsets = [0, 24], sizes = [8, 8], strides = [1, 1]} : vector<16x32xf32> to vector<8x8xf32>
    %66 = tpu.concatenate %64, %65 in 0 : vector<8x8xf32>, vector<8x8xf32> -> vector<16x8xf32>
    %67 = vector.extract_strided_slice %35 {offsets = [0, 8], sizes = [8, 8], strides = [1, 1]} : vector<16x16xf32> to vector<8x8xf32>
    %68 = vector.extract_strided_slice %36 {offsets = [0, 8], sizes = [8, 8], strides = [1, 1]} : vector<16x16xf32> to vector<8x8xf32>
    %cst_23 = arith.constant dense<0.000000e+00> : vector<16x8xf32>
    %69 = tpu.matmul %66, %67, %cst_23 {dimension_numbers = #tpu.dot_dimension_numbers<[1], [1], [0], [0], [0, 0, 1, 0], [], []>} : vector<16x8xf32>, vector<8x8xf32>, vector<16x8xf32> -> vector<16x8xf32>
    %cst_24 = arith.constant 0.353553385 : f32
    %70 = vector.broadcast %cst_24 : f32 to vector<16x8xf32>
    %71 = arith.mulf %69, %70 : vector<16x8xf32>
    %72 = arith.addf %71, %39 : vector<16x8xf32>
    %cst_25 = arith.constant dense<0xFF800000> : vector<16xf32>
    %73 = vector.multi_reduction <maximumf>, %72, %cst_25 [1] : vector<16x8xf32> to vector<16xf32>
    %74 = vector.shape_cast %73 : vector<16xf32> to vector<16x1xf32>
    %75 = vector.broadcast %74 : vector<16x1xf32> to vector<16x8xf32>
    %76 = arith.subf %72, %75 : vector<16x8xf32>
    %77 = math.exp %76 : vector<16x8xf32>
    %cst_26 = arith.constant dense<0.000000e+00> : vector<16xf32>
    %78 = vector.multi_reduction <add>, %77, %cst_26 [1] : vector<16x8xf32> to vector<16xf32>
    %79 = vector.shape_cast %78 : vector<16xf32> to vector<16x1xf32>
    %80 = tpu.reciprocal %79 : vector<16x1xf32> -> vector<16x1xf32>
    %81 = vector.broadcast %80 : vector<16x1xf32> to vector<16x8xf32>
    %82 = arith.mulf %77, %81 : vector<16x8xf32>
    %cst_27 = arith.constant dense<0.000000e+00> : vector<16x8xf32>
    %83 = tpu.matmul %82, %68, %cst_27 {dimension_numbers = #tpu.dot_dimension_numbers<[1], [0], [0], [1], [0, 0, 1, 1], [], []>} : vector<16x8xf32>, vector<8x8xf32>, vector<16x8xf32> -> vector<16x8xf32>
    %84 = vector.extract_strided_slice %83 {offsets = [0, 0], sizes = [8, 8], strides = [1, 1]} : vector<16x8xf32> to vector<8x8xf32>
    %c0_28 = arith.constant 0 : index
    %c16 = arith.constant 16 : index
    %85 = vector.load %arg7[%c0_28, %c16] : memref<16x32xf32, #tpu.memory_space<vmem>>, vector<8x8xf32>
    tpu.vector_store %arg7[%c0_28, %c16], %84 {strides = array<i32>} : memref<16x32xf32, #tpu.memory_space<vmem>>, vector<8x8xf32>,
    %86 = vector.extract_strided_slice %83 {offsets = [8, 0], sizes = [8, 8], strides = [1, 1]} : vector<16x8xf32> to vector<8x8xf32>
    %c0_29 = arith.constant 0 : index
    %c24 = arith.constant 24 : index
    %87 = vector.load %arg7[%c0_29, %c24] : memref<16x32xf32, #tpu.memory_space<vmem>>, vector<8x8xf32>
    tpu.vector_store %arg7[%c0_29, %c24], %86 {strides = array<i32>} : memref<16x32xf32, #tpu.memory_space<vmem>>, vector<8x8xf32>,
    %c1 = arith.constant 1 : index
    %c0_30 = arith.constant 0 : index
    %c0_31 = arith.constant 0 : index
    %88 = vector.load %arg5[%c1, %c0_30, %c0_31] : memref<2x8x8xf32, #tpu.memory_space<vmem>>, vector<1x8x8xf32>
    %89 = vector.shape_cast %88 : vector<1x8x8xf32> to vector<8x8xf32>
    %90 = tpu.concatenate %89, %89 in 0 : vector<8x8xf32>, vector<8x8xf32> -> vector<16x8xf32>
    %91 = vector.extract_strided_slice %34 {offsets = [8, 0], sizes = [8, 8], strides = [1, 1]} : vector<16x32xf32> to vector<8x8xf32>
    %92 = vector.extract_strided_slice %34 {offsets = [8, 8], sizes = [8, 8], strides = [1, 1]} : vector<16x32xf32> to vector<8x8xf32>
    %93 = tpu.concatenate %91, %92 in 0 : vector<8x8xf32>, vector<8x8xf32> -> vector<16x8xf32>
    %94 = vector.extract_strided_slice %35 {offsets = [8, 0], sizes = [8, 8], strides = [1, 1]} : vector<16x16xf32> to vector<8x8xf32>
    %95 = vector.extract_strided_slice %36 {offsets = [8, 0], sizes = [8, 8], strides = [1, 1]} : vector<16x16xf32> to vector<8x8xf32>
    %cst_32 = arith.constant dense<0.000000e+00> : vector<16x8xf32>
    %96 = tpu.matmul %93, %94, %cst_32 {dimension_numbers = #tpu.dot_dimension_numbers<[1], [1], [0], [0], [0, 0, 1, 0], [], []>} : vector<16x8xf32>, vector<8x8xf32>, vector<16x8xf32> -> vector<16x8xf32>
    %cst_33 = arith.constant 0.353553385 : f32
    %97 = vector.broadcast %cst_33 : f32 to vector<16x8xf32>
    %98 = arith.mulf %96, %97 : vector<16x8xf32>
    %99 = arith.addf %98, %90 : vector<16x8xf32>
    %cst_34 = arith.constant dense<0xFF800000> : vector<16xf32>
    %100 = vector.multi_reduction <maximumf>, %99, %cst_34 [1] : vector<16x8xf32> to vector<16xf32>
    %101 = vector.shape_cast %100 : vector<16xf32> to vector<16x1xf32>
    %102 = vector.broadcast %101 : vector<16x1xf32> to vector<16x8xf32>
    %103 = arith.subf %99, %102 : vector<16x8xf32>
    %104 = math.exp %103 : vector<16x8xf32>
    %cst_35 = arith.constant dense<0.000000e+00> : vector<16xf32>
    %105 = vector.multi_reduction <add>, %104, %cst_35 [1] : vector<16x8xf32> to vector<16xf32>
    %106 = vector.shape_cast %105 : vector<16xf32> to vector<16x1xf32>
    %107 = tpu.reciprocal %106 : vector<16x1xf32> -> vector<16x1xf32>
    %108 = vector.broadcast %107 : vector<16x1xf32> to vector<16x8xf32>
    %109 = arith.mulf %104, %108 : vector<16x8xf32>
    %cst_36 = arith.constant dense<0.000000e+00> : vector<16x8xf32>
    %110 = tpu.matmul %109, %95, %cst_36 {dimension_numbers = #tpu.dot_dimension_numbers<[1], [0], [0], [1], [0, 0, 1, 1], [], []>} : vector<16x8xf32>, vector<8x8xf32>, vector<16x8xf32> -> vector<16x8xf32>
    %111 = vector.extract_strided_slice %110 {offsets = [0, 0], sizes = [8, 8], strides = [1, 1]} : vector<16x8xf32> to vector<8x8xf32>
    %c8_37 = arith.constant 8 : index
    %c0_38 = arith.constant 0 : index
    %112 = vector.load %arg7[%c8_37, %c0_38] : memref<16x32xf32, #tpu.memory_space<vmem>>, vector<8x8xf32>
    tpu.vector_store %arg7[%c8_37, %c0_38], %111 {strides = array<i32>} : memref<16x32xf32, #tpu.memory_space<vmem>>, vector<8x8xf32>,
    %113 = vector.extract_strided_slice %110 {offsets = [8, 0], sizes = [8, 8], strides = [1, 1]} : vector<16x8xf32> to vector<8x8xf32>
    %c8_39 = arith.constant 8 : index
    %c8_40 = arith.constant 8 : index
    %114 = vector.load %arg7[%c8_39, %c8_40] : memref<16x32xf32, #tpu.memory_space<vmem>>, vector<8x8xf32>
    tpu.vector_store %arg7[%c8_39, %c8_40], %113 {strides = array<i32>} : memref<16x32xf32, #tpu.memory_space<vmem>>, vector<8x8xf32>,
    %115 = vector.extract_strided_slice %34 {offsets = [8, 16], sizes = [8, 8], strides = [1, 1]} : vector<16x32xf32> to vector<8x8xf32>
    %116 = vector.extract_strided_slice %34 {offsets = [8, 24], sizes = [8, 8], strides = [1, 1]} : vector<16x32xf32> to vector<8x8xf32>
    %117 = tpu.concatenate %115, %116 in 0 : vector<8x8xf32>, vector<8x8xf32> -> vector<16x8xf32>
    %118 = vector.extract_strided_slice %35 {offsets = [8, 8], sizes = [8, 8], strides = [1, 1]} : vector<16x16xf32> to vector<8x8xf32>
    %119 = vector.extract_strided_slice %36 {offsets = [8, 8], sizes = [8, 8], strides = [1, 1]} : vector<16x16xf32> to vector<8x8xf32>
    %cst_41 = arith.constant dense<0.000000e+00> : vector<16x8xf32>
    %120 = tpu.matmul %117, %118, %cst_41 {dimension_numbers = #tpu.dot_dimension_numbers<[1], [1], [0], [0], [0, 0, 1, 0], [], []>} : vector<16x8xf32>, vector<8x8xf32>, vector<16x8xf32> -> vector<16x8xf32>
    %cst_42 = arith.constant 0.353553385 : f32
    %121 = vector.broadcast %cst_42 : f32 to vector<16x8xf32>
    %122 = arith.mulf %120, %121 : vector<16x8xf32>
    %123 = arith.addf %122, %90 : vector<16x8xf32>
    %cst_43 = arith.constant dense<0xFF800000> : vector<16xf32>
    %124 = vector.multi_reduction <maximumf>, %123, %cst_43 [1] : vector<16x8xf32> to vector<16xf32>
    %125 = vector.shape_cast %124 : vector<16xf32> to vector<16x1xf32>
    %126 = vector.broadcast %125 : vector<16x1xf32> to vector<16x8xf32>
    %127 = arith.subf %123, %126 : vector<16x8xf32>
    %128 = math.exp %127 : vector<16x8xf32>
    %cst_44 = arith.constant dense<0.000000e+00> : vector<16xf32>
    %129 = vector.multi_reduction <add>, %128, %cst_44 [1] : vector<16x8xf32> to vector<16xf32>
    %130 = vector.shape_cast %129 : vector<16xf32> to vector<16x1xf32>
    %131 = tpu.reciprocal %130 : vector<16x1xf32> -> vector<16x1xf32>
    %132 = vector.broadcast %131 : vector<16x1xf32> to vector<16x8xf32>
    %133 = arith.mulf %128, %132 : vector<16x8xf32>
    %cst_45 = arith.constant dense<0.000000e+00> : vector<16x8xf32>
    %134 = tpu.matmul %133, %119, %cst_45 {dimension_numbers = #tpu.dot_dimension_numbers<[1], [0], [0], [1], [0, 0, 1, 1], [], []>} : vector<16x8xf32>, vector<8x8xf32>, vector<16x8xf32> -> vector<16x8xf32>
    %135 = vector.extract_strided_slice %134 {offsets = [0, 0], sizes = [8, 8], strides = [1, 1]} : vector<16x8xf32> to vector<8x8xf32>
    %c8_46 = arith.constant 8 : index
    %c16_47 = arith.constant 16 : index
    %136 = vector.load %arg7[%c8_46, %c16_47] : memref<16x32xf32, #tpu.memory_space<vmem>>, vector<8x8xf32>
    tpu.vector_store %arg7[%c8_46, %c16_47], %135 {strides = array<i32>} : memref<16x32xf32, #tpu.memory_space<vmem>>, vector<8x8xf32>,
    %137 = vector.extract_strided_slice %134 {offsets = [8, 0], sizes = [8, 8], strides = [1, 1]} : vector<16x8xf32> to vector<8x8xf32>
    %c8_48 = arith.constant 8 : index
    %c24_49 = arith.constant 24 : index
    %138 = vector.load %arg7[%c8_48, %c24_49] : memref<16x32xf32, #tpu.memory_space<vmem>>, vector<8x8xf32>
    tpu.vector_store %arg7[%c8_48, %c24_49], %137 {strides = array<i32>} : memref<16x32xf32, #tpu.memory_space<vmem>>, vector<8x8xf32>,
    %c0_50 = arith.constant 0 : index
    %c0_51 = arith.constant 0 : index
    %139 = vector.load %arg7[%c0_50, %c0_51] : memref<16x32xf32, #tpu.memory_space<vmem>>, vector<16x32xf32>
    %c0_52 = arith.constant 0 : index
    %c0_53 = arith.constant 0 : index
    %140 = vector.load %arg3[%c0_52, %c0_53] : memref<32x32xf32, #tpu.memory_space<vmem>>, vector<32x32xf32>
    %cst_54 = arith.constant dense<0.000000e+00> : vector<16x32xf32>
    %141 = tpu.matmul %139, %140, %cst_54 {dimension_numbers = #tpu.dot_dimension_numbers<[1], [1], [0], [0], [0, 0, 1, 0], [], []>} : vector<16x32xf32>, vector<32x32xf32>, vector<16x32xf32> -> vector<16x32xf32>
    %142 = tpu.concatenate %141, %35, %36 in 1 : vector<16x32xf32>, vector<16x16xf32>, vector<16x16xf32> -> vector<16x64xf32>
    %c0_55 = arith.constant 0 : index
    %c0_56 = arith.constant 0 : index
    %143 = vector.load %arg6[%c0_55, %c0_56] : memref<16x64xf32, #tpu.memory_space<vmem>>, vector<16x64xf32>
    tpu.vector_store %arg6[%c0_55, %c0_56], %142 {strides = array<i32>} : memref<16x64xf32, #tpu.memory_space<vmem>>, vector<16x64xf32>,
    return
  }
  func.func @transform_0(%arg0: i32) -> (i32, i32) {
    %c0_i32 = arith.constant 0 : i32
    %c0_i32_0 = arith.constant 0 : i32
    %c0_i32_1 = arith.constant 0 : i32
    return %c0_i32, %c0_i32_0 : i32, i32
  }
  func.func @transform_1(%arg0: i32) -> (i32, i32) {
    %c0_i32 = arith.constant 0 : i32
    %c0_i32_0 = arith.constant 0 : i32
    %c0_i32_1 = arith.constant 0 : i32
    return %c0_i32, %c0_i32_0 : i32, i32
  }
  func.func @transform_2(%arg0: i32) -> (i32, i32) {
    %c0_i32 = arith.constant 0 : i32
    %c0_i32_0 = arith.constant 0 : i32
    %c0_i32_1 = arith.constant 0 : i32
    return %c0_i32, %c0_i32_0 : i32, i32
  }
  func.func @transform_3(%arg0: i32) -> (i32, i32) {
    %c0_i32 = arith.constant 0 : i32
    %c0_i32_0 = arith.constant 0 : i32
    %c0_i32_1 = arith.constant 0 : i32
    return %c0_i32, %c0_i32_0 : i32, i32
  }
  func.func @transform_4(%arg0: i32) -> (i32, i32, i32) {
    %c0_i32 = arith.constant 0 : i32
    %c0_i32_0 = arith.constant 0 : i32
    %c0_i32_1 = arith.constant 0 : i32
    %c0_i32_2 = arith.constant 0 : i32
    return %c0_i32, %c0_i32_0, %c0_i32_1 : i32, i32, i32
  }
  func.func @transform_5(%arg0: i32) -> (i32, i32) {
    %c0_i32 = arith.constant 0 : i32
    %c0_i32_0 = arith.constant 0 : i32
    %c0_i32_1 = arith.constant 0 : i32
    return %c0_i32, %c0_i32_0 : i32, i32
  }
}

</mosaic_0001>

<bundles_post_ra>
// kernel: tpu_custom_call.1
= control target key start
LH: loop header
LB: loop body
LE: loop exit
PB: predicated region body
PF: predicated region fallthrough
CT: control target
= control target key end

     0   :  { %vm31_vm0 = vcmask 261120   ;;  %s1630_s0 = inlined_call_operand.vmem [shape: f32[16,32], index: 0, kind: input, shape index: {}]   ;;  %s1631_s1 = inlined_call_operand.vmem [shape: f32[64,32], index: 1, kind: input, shape index: {}]   ;;  %s1632_s2 = inlined_call_operand.vmem [shape: f32[32,32], index: 2, kind: input, shape index: {}]   ;;  %s1633_s3 = inlined_call_operand.vmem [shape: f32[16,96], index: 3, kind: input, shape index: {}]   ;;  %s1634_s4 = inlined_call_operand.vmem [shape: f32[2,8,8], index: 4, kind: input, shape index: {}]   ;;  %s1635_s5 = inlined_call_operand.hbm [shape: f32[16,64], index: 5, kind: output, shape index: {}]  }
   0x1   :  { %v30_v0 = vld [vmem:[%s1631_s1 + $0x38] sm:$0xff]  ;;  %v29_v1 = vld [vmem:[%s1631_s1 + $0x30] sm:$0xff]  ;;  %v21_v2 = vld [vmem:[%s1630_s0] sm:$0xff] }
   0x2   :  { %1227 = vmatprep.subr.msk.mxu0 %vm31_vm0, %v30_v0  ;;  %1243 = vmatprep.mubr.msk.f32.mxu0 %vm31_vm0, %v21_v2 }
   0x3   :  { %1228 = vmatpush3.xpose.msk.msra.mxu0 %vm31_vm0, %v30_v0 }
   0x4   :  { %1229 = vmatprep.subr.msk.mxu0 %vm31_vm0, %v29_v1 }
   0x5   :  { %10 = vsyncpa [#allocation4], 0  ;;  %v28_v3 = vld [vmem:[%s1631_s1 + $0x28] sm:$0xff]  ;;  %v27_v4 = vld [vmem:[%s1631_s1 + $0x20] sm:$0xff]  ;;  %s1364_s15 = smov 80   ;;  %s1366_s16 = smov 4  }
   0x6   :  { %v26_v5 = vld [vmem:[%s1631_s1 + $0x18] sm:$0xff]  ;;  %v25_v6 = vld [vmem:[%s1631_s1 + $0x10] sm:$0xff]  ;;  %v24_v7 = vld [vmem:[%s1631_s1 + $0x8] sm:$0xff]  ;;  %vm157_vm1 = vcmask 31744   ;;  %vm160_vm2 = vcmask 64512   ;;  %vm163_vm3 = vcmask 97280  }
   0x7   :  { %1230 = vmatpush3.xpose.msk.msra.mxu0 %vm31_vm0, %v29_v1  ;;  %v23_v8 = vld [vmem:[%s1631_s1] sm:$0xff]  ;;  %v22_v9 = vld [vmem:[%s1630_s0 + $0x8] sm:$0xff]  ;;  %s1365_s1 = smov 124   ;;  %vm166_vm4 = vcmask 130048   ;;  %vm169_vm5 = vcmask 162816   ;;  %vm172_vm6 = vcmask 195584  }
   0x8   :  { %1231 = vmatprep.subr.msk.mxu0 %vm31_vm0, %v28_v3  ;;  %v137_v10 = vld [vmem:[%s1633_s3] sm:$0xff]  ;;  %vm175_vm7 = vcmask 228352   ;;  %vm180_vm8 = vcmask 293888   ;;  %vm183_vm9 = vcmask 326656   ;;  %vm186_vm10 = vcmask 359424   ;;  %s1367_s0 = smov 120  }
   0x9   :  { %193 = vrot.lane.b32.xlu1 %v137_v10, %s1364_s15  ;;  %s1368_s17 = smov 96   ;;  %v203_v34 = vld [vmem:[%s1634_s4] sm:$0xff]  ;;  %s1369_s20 = smov 88   ;;  %vm405_vm11 = vcmask 130112   ;;  %vm608_vm12 = vcmask 195712   ;;  %vm614_vm13 = vcmask 261312  }
   0xa   :  { %s1370_s21 = smov 112   ;;  %s1373_s26 = smov 16   ;;  %vm1128_vm14 = vcmask 392192   ;;  %vm1131_vm15 = vcmask 523264  }
   0xb   :  { %1232 = vmatpush3.xpose.msk.msra.mxu0 %vm31_vm0, %v28_v3  ;;  %s1374_s27 = smov 24  }
   0xc   :  { %1233 = vmatprep.subr.msk.mxu0 %vm31_vm0, %v27_v4 }
   0xf   :  { %1234 = vmatpush3.xpose.msk.msra.mxu0 %vm31_vm0, %v27_v4 }
  0x10   :  { %1235 = vmatprep.subr.msk.mxu0 %vm31_vm0, %v26_v5 }
  0x13   :  { %1236 = vmatpush3.xpose.msk.msra.mxu0 %vm31_vm0, %v26_v5 }
  0x14   :  { %1237 = vmatprep.subr.msk.mxu0 %vm31_vm0, %v25_v6 }
  0x17   :  { %1238 = vmatpush3.xpose.msk.msra.mxu0 %vm31_vm0, %v25_v6 }
  0x18   :  { %1239 = vmatprep.subr.msk.mxu0 %vm31_vm0, %v24_v7 }
  0x1b   :  { %1240 = vmatpush3.xpose.msk.msra.mxu0 %vm31_vm0, %v24_v7 }
  0x1c   :  { %1241 = vmatprep.subr.msk.mxu0 %vm31_vm0, %v23_v8 }
  0x1f   :  { %1242 = vmatpush3.xpose.msk.msra.mxu0 %vm31_vm0, %v23_v8 }
  0x22   :  { %1244 = vmatmul.mubr.msk.f32.vlgmr.msra.gmra.mxu0 %vm31_vm0, %v22_v9  ;;  %v138_v9 = vld [vmem:[%s1633_s3 + $0x8] sm:$0xff]  ;;  %s1371_s3 = smov 72  }
  0x7b   :  { %v194_v24 = vpop.permute.xlu1 %193 }
  0xe2   :  { %v1459_v11 = vpop.f32.mrf.mxu0 }
  0xe3   :  { %v140_v8 = vsub.f32 0.0, %v1459_v11 }
  0xe4   :  { %v1461_v12 = vpop.f32.mrf.mxu0 }
  0xe5   :  { %v139_v13 = vsub.f32 0.0, %v1461_v12  ;;  %v189_v28 = vmul.f32 %v137_v10, %v1461_v12 }
  0xe7   :  { %143 = vrot.lane.b32.xlu0 %v139_v13, %s1365_s1 }
  0xeb   :  { %151 = vrot.lane.b32.xlu0 %v1461_v12, %s1366_s16 }
 0x159   :  { %v144_v14 = vpop.permute.xlu0 %143 }
 0x15d   :  { %v152_v15 = vpop.permute.xlu0 %151 }
 0x15e   :  { %v158_v16 = vsel %vm157_vm1, %v144_v14, %v152_v15 }
 0x15f   :  { %v161_v17 = vsel %vm160_vm2, %v158_v16, %v144_v14 }
 0x160   :  { %v164_v18 = vsel %vm163_vm3, %v161_v17, %v152_v15 }
 0x161   :  { %v167_v19 = vsel %vm166_vm4, %v164_v18, %v144_v14 }
 0x162   :  { %v170_v20 = vsel %vm169_vm5, %v167_v19, %v152_v15 }
 0x163   :  { %v173_v21 = vsel %vm172_vm6, %v170_v20, %v144_v14 }
 0x164   :  { %v176_v22 = vsel %vm175_vm7, %v173_v21, %v152_v15 }
 0x165   :  { %v178_v23 = vsel %vm31_vm0, %v176_v22, %v144_v14 }
 0x166   :  { %v181_v25 = vsel %vm180_vm8, %v178_v23, %v152_v15 }
 0x167   :  { %v184_v26 = vsel %vm183_vm9, %v181_v25, %v144_v14 }
 0x168   :  { %v187_v27 = vsel %vm186_vm10, %v184_v26, %v152_v15 }
 0x169   :  { %v199_v29 = vmul.f32 %v194_v24, %v187_v27 }
 0x16b   :  { %v1479_v30 = vadd.f32 %v199_v29, %v189_v28 }
 0x16d   :  { %205 = vrot.lane.b32.xlu0 %v1479_v30, %s1367_s0  ;;  %207 = vrot.lane.b32.xlu1 %v1479_v30, %s1368_s17 }
 0x16e   :  { %1248 = vmatprep.mubr.msk.f32.mxu1 %vm160_vm2, %v1479_v30 }
 0x1df   :  { %v208_v31 = vpop.permute.xlu1 %207  ;;  %v206_v32 = vpop.permute.xlu0 %205 }
 0x1e0   :  { %1246 = vmatprep.subr.msk.mxu1 %vm160_vm2, %v208_v31 }
 0x1e1   :  { %1247 = vmatpush3.xpose.msk.msra.mxu1 %vm160_vm2, %v208_v31 }
 0x1e4   :  { %1249 = vmatmul.mubr.msk.f32.vlgmr.msra.gmra.mxu1 %vm160_vm2, %v206_v32 }
 0x2a4   :  { %v1250_v33 = vpop.f32.mrf.mxu1 }
 0x2a5   :  { %v291_v35 = vmul.f32 0.35355338, %v1250_v33 }
 0x2a6   :  { %v281_v36 = vpop.f32.mrf.mxu1 }
 0x2a7   :  { %v290_v37 = vmul.f32 0.35355338, %v281_v36  ;;  %v293_v38 = vadd.f32 %v291_v35, %v203_v34 }
 0x2a9   :  { %v297_v39 = vsel %vm160_vm2, %v293_v38, -inf  ;;  %v292_v40 = vadd.f32 %v290_v37, %v203_v34 }
 0x2aa   :  { %298 = vmax.xlane.f32.xlu0 %v297_v39 }
 0x2ab   :  { %v294_v41 = vsel %vm160_vm2, %v292_v40, -inf }
 0x2ac   :  { %295 = vmax.xlane.f32.xlu1 %v294_v41 }
 0x333   :  { %v299_v42 = vpop.xlane.xlu0 %298 }
 0x334   :  { %v301_v43 = vsub.f32 %v293_v38, %v299_v42  ;;  %v190_v38 = vmul.f32 %v1459_v11, %v138_v9 }
 0x335   :  { %v296_v44 = vpop.xlane.xlu1 %295 }
 0x336   :  { %v304_v45 = vmul.f32 1.442695, %v301_v43  ;;  %v300_v46 = vsub.f32 %v292_v40, %v296_v44 }
 0x338   :  { %1310 = vpow2.f32 %v304_v45  ;;  %v302_v47 = vmul.f32 1.442695, %v300_v46 }
 0x33a   :  { %1312 = vpow2.f32 %v302_v47 }
 0x345   :  { %v1311_v48 = vpop.eup %1310 }
 0x346   :  { %v309_v49 = vsel %vm160_vm2, %v1311_v48, 0.0 }
 0x347   :  { %v1313_v50 = vpop.eup %1312  ;;  %310 = vadd.xlane.f32.xlu1 %v309_v49 }
 0x348   :  { %v306_v51 = vsel %vm160_vm2, %v1313_v50, 0.0 }
 0x349   :  { %307 = vadd.xlane.f32.xlu0 %v306_v51 }
 0x358   :  { %411 = vrot.lane.b32.xlu1 %v1479_v30, %s1369_s20 }
 0x35c   :  { %407 = vrot.lane.b32.xlu1 %v1479_v30, %s1370_s21 }
 0x35f   :  { %316 = vrot.lane.b32.xlu0 %v1461_v12, %s1364_s15 }
 0x363   :  { %409 = vrot.lane.b32.xlu0 %v206_v32, %s1370_s21 }
 0x3d0   :  { %v311_v52 = vpop.xlane.xlu1 %310 }
 0x3d1   :  { %1314 = vrcp.f32 %v311_v52  ;;  %v1170_v52 = vld [vmem:[%s1634_s4 + $0x8] sm:$0xff]  ;;  %s1372_s4 = smov 8  }
 0x3d2   :  { %v308_v53 = vpop.xlane.xlu0 %307 }
 0x3d3   :  { %1316 = vrcp.f32 %v308_v53 }
 0x3d4   :  { %v412_v55 = vpop.permute.xlu1 %411 }
 0x3d6   :  { %v317_v54 = vpop.permute.xlu0 %316 }
 0x3d7   :  { %1251 = vmatprep.subr.mxu1 %v317_v54 }
 0x3d8   :  { %1252 = vmatpush3.msra.mxu1 %v317_v54  ;;  %v408_v60 = vpop.permute.xlu1 %407 }
 0x3d9   :  { %1256 = vmatprep.subr.msk.mxu1 %vm160_vm2, %v412_v55 }
 0x3da   :  { %v410_v61 = vpop.permute.xlu0 %409 }
 0x3de   :  { %v1315_v56 = vpop.eup %1314 }
 0x3df   :  { %v315_v59 = vmul.f32 %v1315_v56, %v1311_v48 }
 0x3e0   :  { %v1317_v57 = vpop.eup %1316 }
 0x3e1   :  { %v314_v58 = vmul.f32 %v1317_v57, %v1313_v50 }
 0x3e3   :  { %1253 = vmatprep.mubr.msk.f32.mxu1 %vm160_vm2, %v314_v58 }
 0x3e4   :  { %1254 = vmatmul.mubr.msk.f32.vlgmr.msra.gmra.mxu1 %vm160_vm2, %v315_v59 }
 0x3e5   :  { %1257 = vmatpush3.xpose.msk.msra.mxu1 %vm160_vm2, %v412_v55  ;;  %1258 = vmatprep.mubr.msk.f32.mxu1 %vm160_vm2, %v408_v60 }
 0x3e8   :  { %1259 = vmatmul.mubr.msk.f32.vlgmr.msra.gmra.mxu1 %vm160_vm2, %v410_v61 }
 0x4a4   :  { %v1510_v62 = vpop.f32.mrf.mxu1 }
 0x4a6   :  { %v391_v63 = vpop.f32.mrf.mxu1 }
 0x4a7   :  { %400 = vst.msk [vmem:[#allocation2] sm:$0xff] %vm160_vm2, %v391_v63 }
 0x4a8   :  { %v1260_v0 = vpop.f32.mrf.mxu1 }
 0x4a9   :  { %v495_v1 = vmul.f32 0.35355338, %v1260_v0 }
 0x4aa   :  { %v485_v2 = vpop.f32.mrf.mxu1 }
 0x4ab   :  { %v494_v3 = vmul.f32 0.35355338, %v485_v2  ;;  %v497_v4 = vadd.f32 %v495_v1, %v203_v34 }
 0x4ad   :  { %v501_v5 = vsel %vm160_vm2, %v497_v4, -inf  ;;  %v496_v6 = vadd.f32 %v494_v3, %v203_v34 }
 0x4ae   :  { %502 = vmax.xlane.f32.xlu0 %v501_v5 }
 0x4af   :  { %v498_v7 = vsel %vm160_vm2, %v496_v6, -inf }
 0x4b0   :  { %499 = vmax.xlane.f32.xlu1 %v498_v7 }
 0x4c1   :  { %153 = vrot.lane.b32.xlu1 %v1459_v11, %s1366_s16 }
 0x4c4   :  { %145 = vrot.lane.b32.xlu0 %v140_v8, %s1365_s1 }
 0x4c5   :  { %195 = vrot.lane.b32.xlu1 %v138_v9, %s1364_s15 }
 0x537   :  { %v503_v10 = vpop.xlane.xlu0 %502 }
 0x538   :  { %v505_v13 = vsub.f32 %v497_v4, %v503_v10 }
 0x539   :  { %v500_v14 = vpop.xlane.xlu1 %499 }
 0x53a   :  { %v508_v15 = vmul.f32 1.442695, %v505_v13  ;;  %v504_v16 = vsub.f32 %v496_v6, %v500_v14 }
 0x53b   :  { %v146_v18 = vpop.permute.xlu0 %145 }
 0x53c   :  { %1318 = vpow2.f32 %v508_v15  ;;  %v506_v17 = vmul.f32 1.442695, %v504_v16 }
 0x53d   :  { %v154_v19 = vpop.permute.xlu1 %153 }
 0x53e   :  { %1320 = vpow2.f32 %v506_v17  ;;  %v159_v20 = vsel %vm157_vm1, %v146_v18, %v154_v19 }
 0x53f   :  { %v162_v21 = vsel %vm160_vm2, %v159_v20, %v146_v18 }
 0x540   :  { %v165_v22 = vsel %vm163_vm3, %v162_v21, %v154_v19 }
 0x541   :  { %v168_v23 = vsel %vm166_vm4, %v165_v22, %v146_v18  ;;  %v196_v36 = vpop.permute.xlu1 %195 }
 0x542   :  { %v171_v24 = vsel %vm169_vm5, %v168_v23, %v154_v19 }
 0x543   :  { %v174_v25 = vsel %vm172_vm6, %v171_v24, %v146_v18 }
 0x544   :  { %v177_v26 = vsel %vm175_vm7, %v174_v25, %v154_v19 }
 0x545   :  { %v179_v28 = vsel %vm31_vm0, %v177_v26, %v146_v18 }
 0x546   :  { %v182_v33 = vsel %vm180_vm8, %v179_v28, %v154_v19 }
 0x547   :  { %v185_v34 = vsel %vm183_vm9, %v182_v33, %v146_v18 }
 0x548   :  { %v188_v35 = vsel %vm186_vm10, %v185_v34, %v154_v19 }
 0x549   :  { %v1319_v27 = vpop.eup %1318  ;;  %v200_v37 = vmul.f32 %v196_v36, %v188_v35 }
 0x54a   :  { %v513_v29 = vsel %vm160_vm2, %v1319_v27, 0.0 }
 0x54b   :  { %v1321_v31 = vpop.eup %1320  ;;  %514 = vadd.xlane.f32.xlu1 %v513_v29  ;;  %v1537_v39 = vadd.f32 %v200_v37, %v190_v38 }
 0x54c   :  { %v510_v32 = vsel %vm160_vm2, %v1321_v31, 0.0 }
 0x54d   :  { %511 = vadd.xlane.f32.xlu0 %v510_v32 }
 0x55c   :  { %621 = vrot.lane.b32.xlu1 %v1537_v39, %s1368_s17 }
 0x563   :  { %520 = vrot.lane.b32.xlu0 %v1461_v12, %s1371_s3 }
 0x567   :  { %619 = vrot.lane.b32.xlu0 %v1537_v39, %s1367_s0 }
 0x5d4   :  { %v515_v40 = vpop.xlane.xlu1 %514 }
 0x5d5   :  { %1322 = vrcp.f32 %v515_v40 }
 0x5d6   :  { %v512_v41 = vpop.xlane.xlu0 %511 }
 0x5d7   :  { %1324 = vrcp.f32 %v512_v41 }
 0x5d8   :  { %v622_v43 = vpop.permute.xlu1 %621 }
 0x5da   :  { %v521_v42 = vpop.permute.xlu0 %520 }
 0x5db   :  { %1261 = vmatprep.subr.mxu1 %v521_v42 }
 0x5dc   :  { %1262 = vmatpush3.msra.mxu1 %v521_v42 }
 0x5dd   :  { %1266 = vmatprep.subr.msk.mxu1 %vm160_vm2, %v622_v43 }
 0x5de   :  { %v620_v48 = vpop.permute.xlu0 %619 }
 0x5e2   :  { %v1323_v44 = vpop.eup %1322 }
 0x5e3   :  { %v519_v47 = vmul.f32 %v1323_v44, %v1319_v27 }
 0x5e4   :  { %v1325_v45 = vpop.eup %1324 }
 0x5e5   :  { %v518_v46 = vmul.f32 %v1325_v45, %v1321_v31 }
 0x5e7   :  { %1263 = vmatprep.mubr.msk.f32.mxu1 %vm160_vm2, %v518_v46 }
 0x5e8   :  { %1264 = vmatmul.mubr.msk.f32.vlgmr.msra.gmra.mxu1 %vm160_vm2, %v519_v47 }
 0x5e9   :  { %1267 = vmatpush3.xpose.msk.msra.mxu1 %vm160_vm2, %v622_v43  ;;  %1268 = vmatprep.mubr.msk.f32.mxu1 %vm160_vm2, %v1537_v39 }
 0x5ec   :  { %1269 = vmatmul.mubr.msk.f32.vlgmr.msra.gmra.mxu1 %vm160_vm2, %v620_v48 }
 0x6a8   :  { %v1552_v49 = vpop.f32.mrf.mxu1 }
 0x6aa   :  { %v1554_v50 = vpop.f32.mrf.mxu1 }
 0x6ac   :  { %v1270_v51 = vpop.f32.mrf.mxu1 }
 0x6ad   :  { %v705_v53 = vmul.f32 0.35355338, %v1270_v51 }
 0x6ae   :  { %v695_v54 = vpop.f32.mrf.mxu1 }
 0x6af   :  { %v704_v55 = vmul.f32 0.35355338, %v695_v54  ;;  %v707_v56 = vadd.f32 %v1170_v52, %v705_v53  ;;  %v1031_v53 = vld [vmem:[%s1632_s2 + $0x10] sm:$0xff]  ;;  %v1030_v54 = vld [vmem:[%s1632_s2 + $0x8] sm:$0xff] }
 0x6b1   :  { %v711_v57 = vsel %vm160_vm2, %v707_v56, -inf  ;;  %v706_v58 = vadd.f32 %v1170_v52, %v704_v55  ;;  %v1029_v55 = vld [vmem:[%s1632_s2] sm:$0xff] }
 0x6b2   :  { %712 = vmax.xlane.f32.xlu0 %v711_v57 }
 0x6b3   :  { %v708_v59 = vsel %vm160_vm2, %v706_v58, -inf }
 0x6b4   :  { %709 = vmax.xlane.f32.xlu1 %v708_v59 }
 0x73b   :  { %v713_v60 = vpop.xlane.xlu0 %712 }
 0x73c   :  { %v715_v61 = vsub.f32 %v707_v56, %v713_v60 }
 0x73d   :  { %v710_v63 = vpop.xlane.xlu1 %709 }
 0x73e   :  { %v718_v0 = vmul.f32 1.442695, %v715_v61  ;;  %v714_v1 = vsub.f32 %v706_v58, %v710_v63 }
 0x740   :  { %1326 = vpow2.f32 %v718_v0  ;;  %v716_v2 = vmul.f32 1.442695, %v714_v1 }
 0x742   :  { %1328 = vpow2.f32 %v716_v2 }
 0x74d   :  { %v1327_v3 = vpop.eup %1326 }
 0x74e   :  { %v723_v4 = vsel %vm160_vm2, %v1327_v3, 0.0 }
 0x74f   :  { %v1329_v5 = vpop.eup %1328  ;;  %724 = vadd.xlane.f32.xlu1 %v723_v4 }
 0x750   :  { %v720_v6 = vsel %vm160_vm2, %v1329_v5, 0.0 }
 0x751   :  { %721 = vadd.xlane.f32.xlu0 %v720_v6 }
 0x760   :  { %824 = vrot.lane.b32.xlu1 %v1537_v39, %s1369_s20 }
 0x764   :  { %820 = vrot.lane.b32.xlu1 %v1537_v39, %s1370_s21 }
 0x767   :  { %730 = vrot.lane.b32.xlu0 %v1459_v11, %s1364_s15 }
 0x76b   :  { %822 = vrot.lane.b32.xlu0 %v620_v48, %s1370_s21 }
 0x7d8   :  { %v725_v7 = vpop.xlane.xlu1 %724 }
 0x7d9   :  { %1330 = vrcp.f32 %v725_v7 }
 0x7da   :  { %v722_v8 = vpop.xlane.xlu0 %721 }
 0x7db   :  { %1332 = vrcp.f32 %v722_v8 }
 0x7dc   :  { %v825_v10 = vpop.permute.xlu1 %824 }
 0x7de   :  { %v731_v9 = vpop.permute.xlu0 %730 }
 0x7df   :  { %1271 = vmatprep.subr.mxu1 %v731_v9 }
 0x7e0   :  { %1272 = vmatpush3.msra.mxu1 %v731_v9  ;;  %v821_v17 = vpop.permute.xlu1 %820 }
 0x7e1   :  { %1276 = vmatprep.subr.msk.mxu1 %vm160_vm2, %v825_v10 }
 0x7e2   :  { %v823_v18 = vpop.permute.xlu0 %822 }
 0x7e6   :  { %v1331_v13 = vpop.eup %1330 }
 0x7e7   :  { %v729_v16 = vmul.f32 %v1331_v13, %v1327_v3 }
 0x7e8   :  { %v1333_v14 = vpop.eup %1332 }
 0x7e9   :  { %v728_v15 = vmul.f32 %v1333_v14, %v1329_v5 }
 0x7eb   :  { %1273 = vmatprep.mubr.msk.f32.mxu1 %vm160_vm2, %v728_v15 }
 0x7ec   :  { %1274 = vmatmul.mubr.msk.f32.vlgmr.msra.gmra.mxu1 %vm160_vm2, %v729_v16 }
 0x7ed   :  { %1277 = vmatpush3.xpose.msk.msra.mxu1 %vm160_vm2, %v825_v10  ;;  %1278 = vmatprep.mubr.msk.f32.mxu1 %vm160_vm2, %v821_v17 }
 0x7f0   :  { %1279 = vmatmul.mubr.msk.f32.vlgmr.msra.gmra.mxu1 %vm160_vm2, %v823_v18 }
 0x8ac   :  { %v1275_v19 = vpop.f32.mrf.mxu1 }
 0x8ae   :  { %v805_v20 = vpop.f32.mrf.mxu1 }
 0x8af   :  { %814 = vst.msk [vmem:[#allocation2 + $0x8] sm:$0xff] %vm160_vm2, %v805_v20 }
 0x8b0   :  { %v1280_v21 = vpop.f32.mrf.mxu1 }
 0x8b1   :  { %v908_v22 = vmul.f32 0.35355338, %v1280_v21 }
 0x8b2   :  { %v898_v23 = vpop.f32.mrf.mxu1 }
 0x8b3   :  { %v907_v24 = vmul.f32 0.35355338, %v898_v23  ;;  %v910_v25 = vadd.f32 %v1170_v52, %v908_v22 }
 0x8b5   :  { %v914_v26 = vsel %vm160_vm2, %v910_v25, -inf  ;;  %v909_v27 = vadd.f32 %v1170_v52, %v907_v24  ;;  %v1032_v52 = vld [vmem:[%s1632_s2 + $0x18] sm:$0xff]  ;;  %s1375_s2 = smov [#allocation3]  }
 0x8b6   :  { %915 = vmax.xlane.f32.xlu0 %v914_v26  ;;  %1286 = vmatprep.subr.msk.mxu0 %vm31_vm0, %v1032_v52  ;;  %s1139_s11 = sshll.u32 %s1375_s2, 4  ;;  %s1140_s11 = int_to_ptr.vmem [resolvable:$true] %s1139_s11 }
 0x8b7   :  { %v911_v28 = vsel %vm160_vm2, %v909_v27, -inf  ;;  %1287 = vmatpush3.xpose.msk.msra.mxu0 %vm31_vm0, %v1032_v52  ;;  %s1342_s12 = scalar_lea.vmem %s1140_s11, 256  ;;  %p1347_p1 = scmp.lt.s32.totalorder %s1140_s11, %s1140_s11 }
 0x8b8   :  { %912 = vmax.xlane.f32.xlu1 %v911_v28  ;;  %1288 = vmatprep.subr.msk.mxu0 %vm31_vm0, %v1031_v53  ;;  %p1343_p0 = scmp.ne.s32.totalorder %s1140_s11, %s1342_s12  ;;  %p1348_p2 = scmp.lt.s32.totalorder %s1342_s12, %s1342_s12 }
 0x8ba   :  { %p1349_p3 = por %p1348_p2, %p1347_p1 }
 0x8bb   :  { %1289 = vmatpush3.xpose.msk.msra.mxu0 %vm31_vm0, %v1031_v53 }
 0x8bc   :  { %1290 = vmatprep.subr.msk.mxu0 %vm31_vm0, %v1030_v54  ;;  %p1350_p4 = pnand %p1349_p3, %p1343_p0 }
 0x8bf   :  { %1291 = vmatpush3.xpose.msk.msra.mxu0 %vm31_vm0, %v1030_v54 }
 0x8c0   :  { %1292 = vmatprep.subr.msk.mxu0 %vm31_vm0, %v1029_v55 }
 0x8c3   :  { %1293 = vmatpush3.xpose.msk.msra.mxu0 %vm31_vm0, %v1029_v55 }
 0x93f   :  { %v916_v29 = vpop.xlane.xlu0 %915 }
 0x940   :  { %v918_v31 = vsub.f32 %v910_v25, %v916_v29 }
 0x941   :  { %v913_v32 = vpop.xlane.xlu1 %912 }
 0x942   :  { %v921_v33 = vmul.f32 1.442695, %v918_v31  ;;  %v917_v34 = vsub.f32 %v909_v27, %v913_v32 }
 0x944   :  { %1334 = vpow2.f32 %v921_v33  ;;  %v919_v35 = vmul.f32 1.442695, %v917_v34 }
 0x946   :  { %1336 = vpow2.f32 %v919_v35 }
 0x951   :  { %v1335_v36 = vpop.eup %1334 }
 0x952   :  { %v926_v37 = vsel %vm160_vm2, %v1335_v36, 0.0 }
 0x953   :  { %v1337_v38 = vpop.eup %1336  ;;  %927 = vadd.xlane.f32.xlu1 %v926_v37 }
 0x954   :  { %v923_v40 = vsel %vm160_vm2, %v1337_v38, 0.0 }
 0x955   :  { %924 = vadd.xlane.f32.xlu0 %v923_v40 }
 0x964   :  { %402 = vrot.lane.b32.xlu1 %v1510_v62, %s1372_s4 }
 0x968   :  { %605 = vrot.lane.b32.xlu1 %v1554_v50, %s1373_s26 }
 0x96b   :  { %933 = vrot.lane.b32.xlu0 %v1459_v11, %s1371_s3 }
 0x96c   :  { %611 = vrot.lane.b32.xlu1 %v1552_v49, %s1374_s27 }
 0x96f   :  { %816 = vrot.lane.b32.xlu0 %v1275_v19, %s1372_s4 }
 0x9dc   :  { %v928_v41 = vpop.xlane.xlu1 %927 }
 0x9dd   :  { %1338 = vrcp.f32 %v928_v41 }
 0x9de   :  { %v925_v42 = vpop.xlane.xlu0 %924 }
 0x9df   :  { %1340 = vrcp.f32 %v925_v42 }
 0x9e0   :  { %v403_v43 = vpop.permute.xlu1 %402 }
 0x9e1   :  { %406 = vst.msk [vmem:[#allocation2] sm:$0xff] %vm405_vm11, %v403_v43 }
 0x9e2   :  { %v934_v62 = vpop.permute.xlu0 %933 }
 0x9e3   :  { %1281 = vmatprep.subr.mxu1 %v934_v62 }
 0x9e4   :  { %1282 = vmatpush3.msra.mxu1 %v934_v62  ;;  %v606_v44 = vpop.permute.xlu1 %605 }
 0x9e5   :  { %609 = vst.msk [vmem:[#allocation2] sm:$0xff] %vm608_vm12, %v606_v44 }
 0x9e6   :  { %v817_v45 = vpop.permute.xlu0 %816 }
 0x9e7   :  { %819 = vst.msk [vmem:[#allocation2 + $0x8] sm:$0xff] %vm405_vm11, %v817_v45 }
 0x9e8   :  { %v612_v46 = vpop.permute.xlu1 %611 }
 0x9e9   :  { %615 = vst.msk [vmem:[#allocation2] sm:$0xff] %vm614_vm13, %v612_v46 }
 0x9ea   :  { %v1339_v47 = vpop.eup %1338 }
 0x9eb   :  { %v932_v50 = vmul.f32 %v1339_v47, %v1335_v36 }
 0x9ec   :  { %v1341_v48 = vpop.eup %1340 }
 0x9ed   :  { %v931_v49 = vmul.f32 %v1341_v48, %v1337_v38 }
 0x9ef   :  { %1283 = vmatprep.mubr.msk.f32.mxu1 %vm160_vm2, %v931_v49 }
 0x9f0   :  { %1284 = vmatmul.mubr.msk.f32.vlgmr.msra.gmra.mxu1 %vm160_vm2, %v932_v50  ;;  %v1027_v51 = vld [vmem:[#allocation2] sm:$0xff] }
 0x9f1   :  { %1294 = vmatprep.mubr.msk.f32.mxu0 %vm31_vm0, %v1027_v51 }
 0xab0   :  { %v1285_v56 = vpop.f32.mrf.mxu1 }
 0xab1   :  { %1023 = vrot.lane.b32.xlu1 %v1285_v56, %s1374_s27 }
 0xab2   :  { %v1008_v57 = vpop.f32.mrf.mxu1 }
 0xab3   :  { %1018 = vrot.lane.b32.xlu0 %v1008_v57, %s1373_s26 }
 0xb23   :  { %v1024_v59 = vpop.permute.xlu1 %1023 }
 0xb25   :  { %v1019_v58 = vpop.permute.xlu0 %1018 }
 0xb26   :  { %1021 = vst.msk [vmem:[#allocation2 + $0x8] sm:$0xff] %vm608_vm12, %v1019_v58 }
 0xb27   :  { %1026 = vst.msk [vmem:[#allocation2 + $0x8] sm:$0xff] %vm614_vm13, %v1024_v59 }
 0xb2e   :  { %v1028_v60 = vld [vmem:[#allocation2 + $0x8] sm:$0xff] }
 0xb2f   :  { %1295 = vmatmul.mubr.msk.f32.vlgmr.msra.gmra.mxu0 %vm31_vm0, %v1028_v60 }
 0xbef   :  { %v1296_v61 = vpop.f32.mrf.mxu0 }
 0xbf0   :  { %v1127_v63 = vsel %vm31_vm0, %v1296_v61, %v1537_v39 }
 0xbf1   :  { %v1130_v0 = vsel %vm1128_vm14, %v1127_v63, %v1459_v11  ;;  %v1117_v1 = vpop.f32.mrf.mxu0 }
 0xbf2   :  { %1133 = vst.msk [vmem:[#allocation3 + $0x8] sm:$0xff] %vm1131_vm15, %v1130_v0  ;;  %v1126_v2 = vsel %vm31_vm0, %v1117_v1, %v1479_v30 }
 0xbf3   :  { %v1129_v3 = vsel %vm1128_vm14, %v1126_v2, %v1461_v12 }
 0xbf4   :  { %1132 = vst.msk [vmem:[#allocation3] sm:$0xff] %vm1131_vm15, %v1129_v3 }
 0xbf5   :  { %1353 = shalt.err (!%p1350_p4)
}
 0xbf6   :  { %s1376_s13 = smov 128  }
 0xbf7   :  { %1145 = dma.vmem_to_hbm [thread:$0]  %s1140_s11, 256, %s1635_s5, [#allocation4], %s1376_s13, %s1376_s13, %s1372_s4  }
 0xbf8   :  { %1362 = dma.done.wait [#allocation4], 256  }
 0xbf9   :  { %1363 = vsyncadd [#allocation4], 4294967040 }
 0xbfa   :  { %1149 = vsyncpa [#allocation4], 1 }

</bundles_post_ra>
